<compile_context>
chip_gen: v7x
topology: tpu7x:2x2x1
jax: 0.10.0
libtpu: 0.0.40
codegen_flags: <defaults>
</compile_context>

<pallas_src>
import functools

import jax
import jax.numpy as jnp
from jax.experimental import pallas as pl
from jax.experimental.pallas import tpu as pltpu

KSIZE = 3  # rfa_block is instantiated with kernel=3 (padding=1 gives "same" size)


def _roll_probe_kernel(x_ref, o_ref):
    o_ref[...] = pltpu.roll(x_ref[...], 1, 1)


@functools.lru_cache(maxsize=1)
def _roll_moves_to_higher_index() -> bool:
    """One-time audit of pltpu.roll's rotation direction (host-side, outside jit).

    Returns True when pltpu.roll matches np.roll (positive shift moves elements toward
    higher indices).  The main kernel picks the shift sign from this so a convention
    change can never silently flip the convolution taps.
    """
    x = jnp.tile(jnp.arange(128, dtype=jnp.float32)[None, :], (8, 1))
    y = pl.pallas_call(
        _roll_probe_kernel,
        out_shape=jax.ShapeDtypeStruct((8, 128), jnp.float32),
    )(x)
    v = float(y[0, 1])
    if v == 0.0:
        return True      # np.roll semantics: out[i] = in[i - shift]
    if v == 2.0:
        return False     # opposite convention: out[i] = in[i + shift]
    raise RuntimeError(f"unexpected pltpu.roll probe value: {v}")


def _rfa_kernel(wt_ref, wo_ref, bo_ref, m_ref, x_ref, o_ref, *, Wp, Pp, roll_up):
    """One batch element per grid step; everything is lane-dense (C, Pp).

    wt_ref: (4, C, 9C) bf16  im2col conv weights, column block = kw*3C + kh*C + ci
    wo_ref: (4, C, C)  bf16  1x1 output conv split into the 4 concat groups
    bo_ref: (C, 1)     f32   1x1 output conv bias
    m_ref : (1, Pp)    f32   interior mask (1 on real pixels, 0 on pad ring/lane pad)
    x_ref : (1, C, Pp)       spatially zero-padded input, flattened & lane-padded
    o_ref : (1, C, Pp)       output block
    """
    f32 = jnp.float32
    bf16 = jnp.bfloat16
    mask = m_ref[...]                               # (1, Pp), broadcasts over channels

    def nb(a, s):
        # Neighbour read along the flattened spatial axis: out[.., p] = a[.., p + s].
        if s == 0:
            return a
        shift = ((-s) if roll_up else s) % Pp
        return pltpu.roll(a, shift, 1)              # XLU lane rotation

    def conv3x3_relu(inp, layer, keep_interior_only):
        # "Same" 3x3 conv as ONE MXU matmul over an im2col stack (depth 9*C).
        # `inp` is exactly zero on the pad ring, which supplies the conv's zero
        # padding; roll wrap-around only contaminates ring/pad positions, which are
        # re-zeroed below (or discarded) — no per-tap border masks needed.
        rows = jnp.concatenate([nb(inp, -Wp), inp, nb(inp, Wp)], axis=0)    # (3C, Pp)
        cols = jnp.concatenate([nb(rows, -1), rows, nb(rows, 1)], axis=0)   # (9C, Pp)
        y = jnp.dot(wt_ref[layer], cols.astype(bf16), preferred_element_type=f32)
        y = jnp.maximum(y, 0.0)
        if keep_interior_only:
            y = y * mask        # keep the pad ring exactly zero for the next conv
        return y

    def out_proj(branch, group):
        # Fold group `group` of the 1x1 output conv in as soon as the branch exists,
        # so b1/b2/b3 never stay live across the whole body.
        return jnp.dot(wo_ref[group], branch.astype(bf16), preferred_element_type=f32)

    x0 = x_ref[0].astype(f32)                       # (C, Pp); zero on ring / pad lanes
    b1 = conv3x3_relu(x0, 0, True)
    xo = out_proj(b1, 0)
    x1 = x0 + b1
    b2 = conv3x3_relu(x1, 1, True)
    xo = xo + out_proj(b2, 1)
    x2 = x1 + b2
    b3 = conv3x3_relu(x2, 2, True)
    xo = xo + out_proj(b3, 2)
    x3 = x2 + b3
    x4 = conv3x3_relu(x3, 3, False)                 # only feeds the 1x1; mask not needed
    xo = xo + out_proj(x4, 3)
    xo = xo + bo_ref[...]                           # (C, 1) bias broadcast over lanes

    # Re-read x for the final residual instead of keeping x0 live across the body.
    o_ref[0] = (x_ref[0].astype(f32) + xo).astype(o_ref.dtype)


def rfa_block(x, w1, w2, w3, w4, w_out, b_out):
    """x: (N, C, H, W); w1..w4: (C, C, 3, 3) OIHW; w_out: (C, 4C, 1, 1); b_out: (C,)."""
    N, C, H, W = x.shape
    CP = ((C + 7) // 8) * 8                         # sublane-aligned channel count
    Hp, Wp = H + 2, W + 2                           # explicit "same"-conv zero pad ring
    Pi = Hp * Wp
    Pp = ((Pi + 127) // 128) * 128                  # lane-dense spatial extent
    pc, pp = CP - C, Pp - Pi

    # Spatially pre-padded, lane-dense input (N, CP, Pp); all padding is zero.
    x_flat = jnp.pad(x, ((0, 0), (0, 0), (1, 1), (1, 1))).reshape(N, C, Pi)
    x_flat = jnp.pad(x_flat, ((0, 0), (0, pc), (0, pp)))

    # Interior mask: 1 on real pixels, 0 on the pad ring and lane padding (hoisted out
    # of the kernel — no per-grid-step iota/div/mod on the VPU).
    p = jnp.arange(Pp, dtype=jnp.int32)
    row, col = p // Wp, p % Wp
    mask = ((row >= 1) & (row <= H) & (col >= 1) & (col <= W) & (p < Pi))
    mask = mask.astype(jnp.float32).reshape(1, Pp)

    # im2col conv weights: (layer, C_out, 9*C_in), column block = kw*3*CP + kh*CP + ci.
    w_stack = jnp.stack([w1, w2, w3, w4]).astype(jnp.float32)        # (4, C, C, 3, 3)
    w_stack = jnp.pad(w_stack, ((0, 0), (0, pc), (0, pc), (0, 0), (0, 0)))
    w_taps = jnp.transpose(w_stack, (0, 1, 4, 3, 2)).reshape(4, CP, 9 * CP)
    w_taps = w_taps.astype(jnp.bfloat16)

    # 1x1 output conv split into its 4 concat groups (group g multiplies branch g).
    wo = jnp.transpose(w_out.reshape(C, 4, C).astype(jnp.float32), (1, 0, 2))
    wo = jnp.pad(wo, ((0, 0), (0, pc), (0, pc))).astype(jnp.bfloat16)
    bo = jnp.pad(b_out.astype(jnp.float32).reshape(C, 1), ((0, pc), (0, 0)))

    kernel = functools.partial(
        _rfa_kernel, Wp=Wp, Pp=Pp, roll_up=_roll_moves_to_higher_index())

    out_flat = pl.pallas_call(
        kernel,
        out_shape=jax.ShapeDtypeStruct((N, CP, Pp), x.dtype),
        grid=(N,),
        in_specs=[
            pl.BlockSpec((4, CP, 9 * CP), lambda n: (0, 0, 0)),     # im2col conv weights
            pl.BlockSpec((4, CP, CP), lambda n: (0, 0, 0)),         # 1x1 group weights
            pl.BlockSpec((CP, 1), lambda n: (0, 0)),                # 1x1 bias
            pl.BlockSpec((1, Pp), lambda n: (0, 0)),                # interior mask
            pl.BlockSpec((1, CP, Pp), lambda n: (n, 0, 0)),         # x (lane-dense)
        ],
        out_specs=pl.BlockSpec((1, CP, Pp), lambda n: (n, 0, 0)),
        compiler_params=pltpu.CompilerParams(
            # Batch elements are independent -> shard across TensorCores.
            dimension_semantics=("parallel",),
            # NOTE: for production shapes add a row-tiled (halo) grid axis marked
            # "parallel" and set vmem_limit_bytes; the toy test needs neither.
        ),
    )(w_taps, wo, bo, mask, x_flat)

    out = out_flat[:, :C, :Pi].reshape(N, C, Hp, Wp)
    return out[:, :, 1:1 + H, 1:1 + W]


def _ref_impl(x, w1, w2, w3, w4, w_out, b_out, *, bf16_operands):
    """Plain-JAX reference mirroring the PyTorch module.

    With bf16_operands=True the conv operands are cast to bf16 (f32 accumulation),
    which numerically mirrors the kernel's MXU path up to summation order.
    """
    dn = ("NCHW", "OIHW", "NCHW")

    def conv(inp, w, pad):
        if bf16_operands:
            inp = inp.astype(jnp.bfloat16)
            w = w.astype(jnp.bfloat16)
            return jax.lax.conv_general_dilated(
                inp, w, (1, 1), [(pad, pad), (pad, pad)], dimension_numbers=dn,
                preferred_element_type=jnp.float32)
        return jax.lax.conv_general_dilated(
            inp, w, (1, 1), [(pad, pad), (pad, pad)], dimension_numbers=dn,
            precision=jax.lax.Precision.HIGHEST)

    def branch(inp, w):
        return jnp.maximum(conv(inp, w, 1), 0.0)

    b1 = branch(x, w1)
    x1 = x + b1
    b2 = branch(x1, w2)
    x2 = x1 + b2
    b3 = branch(x2, w3)
    x3 = x2 + b3
    x4 = branch(x3, w4)
    xcat = jnp.concatenate([b1, b2, b3, x4], axis=1)
    xo = conv(xcat, w_out, 0) + b_out.reshape(1, -1, 1, 1)
    return x + xo


if __name__ == "__main__":
    key = jax.random.PRNGKey(0)
    ks = jax.random.split(key, 7)

    N, C, H, W = 2, 4, 16, 16
    x = jax.random.normal(ks[0], (N, C, H, W), dtype=jnp.float32)

    std3 = (2.0 / (C * KSIZE * KSIZE)) ** 0.5
    w1 = jax.random.normal(ks[1], (C, C, KSIZE, KSIZE), jnp.float32) * std3
    w2 = jax.random.normal(ks[2], (C, C, KSIZE, KSIZE), jnp.float32) * std3
    w3 = jax.random.normal(ks[3], (C, C, KSIZE, KSIZE), jnp.float32) * std3
    w4 = jax.random.normal(ks[4], (C, C, KSIZE, KSIZE), jnp.float32) * std3
    std1 = (2.0 / (4 * C)) ** 0.5
    w_out = jax.random.normal(ks[5], (C, 4 * C, 1, 1), jnp.float32) * std1
    b_out = jax.random.normal(ks[6], (C,), jnp.float32) * 0.5

    out = rfa_block(x, w1, w2, w3, w4, w_out, b_out)
    out = jax.block_until_ready(out)
    assert out.shape == x.shape and out.dtype == x.dtype

    # Strict structural check against a reference that also uses bf16 matmul operands
    # with f32 accumulation (only summation order differs -> tiny error).
    ref_bf16 = _ref_impl(x, w1, w2, w3, w4, w_out, b_out, bf16_operands=True)
    err_bf16 = float(jnp.max(jnp.abs(out - ref_bf16)))
    assert err_bf16 < 1e-2, f"mismatch vs bf16-operand reference: {err_bf16}"

    # Loose sanity check against the full-f32 reference: bounds the bf16 operand
    # degradation; any structural bug (wrong tap/roll/mask/bias) is O(1).
    ref_f32 = _ref_impl(x, w1, w2, w3, w4, w_out, b_out, bf16_operands=False)
    err_f32 = float(jnp.max(jnp.abs(out - ref_f32)))
    assert err_f32 < 2.5e-1, f"mismatch vs f32 reference: {err_f32}"

    print("KERNEL_OK")
</pallas_src>

<mosaic_0001>
module attributes {stable_mosaic.version = 11 : i64} {
  func.func @_roll_probe_kernel(%arg0: memref<8x128xf32, #tpu.memory_space<vmem>>, %arg1: memref<8x128xf32, #tpu.memory_space<vmem>>) attributes {dimension_semantics = [], scalar_prefetch = 0 : i64, scratch_operands = 0 : i64, tpu.core_type = #tpu.core_type<tc>} {
    %c0 = arith.constant 0 : index
    %c0_0 = arith.constant 0 : index
    %0 = vector.load %arg0[%c0, %c0_0] : memref<8x128xf32, #tpu.memory_space<vmem>>, vector<8x128xf32>
    %c1_i32 = arith.constant 1 : i32
    %1 = tpu.dynamic_rotate %0 by %c1_i32 dim 1 : vector<8x128xf32>, i32 -> vector<8x128xf32>
    %c0_1 = arith.constant 0 : index
    %c0_2 = arith.constant 0 : index
    %2 = vector.load %arg1[%c0_1, %c0_2] : memref<8x128xf32, #tpu.memory_space<vmem>>, vector<8x128xf32>
    tpu.vector_store %arg1[%c0_1, %c0_2], %1 {strides = array<i32>} : memref<8x128xf32, #tpu.memory_space<vmem>>, vector<8x128xf32>,
    return
  }
}

</mosaic_0001>

<bundles_post_ra>
// kernel: tpu_custom_call.1
= control target key start
LH: loop header
LB: loop body
LE: loop exit
PB: predicated region body
PF: predicated region fallthrough
CT: control target
= control target key end

     0   :  { %6 = vsyncpa [#allocation3], 0  ;;  %s128_s0 = inlined_call_operand.hbm [shape: f32[8,128], index: 0, kind: input, shape index: {}]   ;;  %s129_s1 = inlined_call_operand.hbm [shape: f32[8,128], index: 1, kind: output, shape index: {}]  }
   0x1   :  { %7 = vsyncpa [#allocation4], 0  ;;  %s91_s6 = smov [#allocation2]   ;;  %s43_s10 = scalar_lea.hbm %s128_s0, 128 }
   0x2   :  { %s14_s7 = sshll.u32 %s91_s6, 4  ;;  %p44_p0 = scmp.ne.s32.totalorder %s128_s0, %s43_s10  ;;  %s15_s7 = int_to_ptr.vmem [resolvable:$true] %s14_s7 }
   0x3   :  { %p47_p1 = scmp.lt.u32.totalorder %s43_s10, %s128_s0 }
   0x5   :  { %p49_p2 = pnand %p47_p1, %p44_p0 }
   0x7   :  { %52 = shalt.err (!%p49_p2)
}
   0x8   :  { %s53_s15 = scalar_lea.vmem %s15_s7, 128  ;;  %p58_p4 = scmp.lt.s32.totalorder %s15_s7, %s15_s7 }
   0x9   :  { %p54_p3 = scmp.ne.s32.totalorder %s15_s7, %s53_s15  ;;  %p59_p5 = scmp.lt.s32.totalorder %s53_s15, %s53_s15 }
   0xb   :  { %p60_p6 = por %p59_p5, %p58_p4 }
   0xd   :  { %p61_p7 = pnand %p60_p6, %p54_p3 }
   0xf   :  { %64 = shalt.err (!%p61_p7)
}
  0x10   :  { %17 = dma.hbm_to_vmem [thread:$0]  %s128_s0, 128, %s15_s7, [#allocation3]  }
  0x11   :  { %87 = dma.done.wait [#allocation3], 128  }
  0x12   :  { %88 = vsyncadd [#allocation3], 4294967168  ;;  %v21_v0 = vld [vmem:[#allocation2] sm:$0xff]  ;;  %s92_s18 = smov 1   ;;  %s93_s19 = smov [#allocation5]  }
  0x13   :  { %22 = vrot.lane.b32.xlu0 %v21_v0, %s92_s18  ;;  %s31_s20 = sshll.u32 %s93_s19, 4  ;;  %s32_s20 = int_to_ptr.vmem [resolvable:$true] %s31_s20 }
  0x14   :  { %s65_s21 = scalar_lea.vmem %s32_s20, 128  ;;  %p70_p9 = scmp.lt.s32.totalorder %s32_s20, %s32_s20 }
  0x15   :  { %p66_p8 = scmp.ne.s32.totalorder %s32_s20, %s65_s21  ;;  %p71_p10 = scmp.lt.s32.totalorder %s65_s21, %s65_s21 }
  0x17   :  { %p72_p11 = por %p71_p10, %p70_p9 }
  0x19   :  { %p73_p12 = pnand %p72_p11, %p66_p8 }
  0x85   :  { %v23_v1 = vpop.permute.xlu0 %22 }
  0x86   :  { %24 = vst [vmem:[#allocation5] sm:$0xff] %v23_v1 }
  0x87   :  { %76 = shalt.err (!%p73_p12)
}
  0x88   :  { %s77_s0 = scalar_lea.hbm %s129_s1, 128 }
  0x89   :  { %p78_p13 = scmp.ne.s32.totalorder %s129_s1, %s77_s0  ;;  %p81_p0 = scmp.lt.u32.totalorder %s77_s0, %s129_s1 }
  0x8b   :  { %p83_p1 = pnand %p81_p0, %p78_p13 }
  0x8d   :  { %86 = shalt.err (!%p83_p1)
}
  0x8e   :  { %34 = dma.vmem_to_hbm [thread:$0]  %s32_s20, 128, %s129_s1, [#allocation4]  }
  0x8f   :  { %89 = dma.done.wait [#allocation4], 128  }
  0x90   :  { %90 = vsyncadd [#allocation4], 4294967168 }
  0x91   :  { %38 = vsyncpa [#allocation3], 1 }
  0x92   :  { %39 = vsyncpa [#allocation4], 1 }

</bundles_post_ra>
